<compile_context>
chip_gen: v5e
topology: v5e:2x2
jax: 0.10.0
libtpu: 0.0.40
codegen_flags: <defaults>
</compile_context>

<pallas_src>
import jax
import jax.numpy as jnp
from jax.experimental import pallas as pl
from jax.experimental.pallas import tpu as pltpu


def inst_encoder_kernel(x_ref, r_ref, u_ref, w1_ref, w2_ref, o_ref):
    # Block shapes at grid point (n, mt):
    #   x_ref : (1, X, TM)     r_ref : (1, R, TM)    u_ref : (1, R, U*V)
    #   w1_ref: (H, R, U*V)    w2_ref: (X*V, H)      o_ref : (1, V, TM)
    f32 = jnp.float32
    mxu_t = r_ref.dtype                   # bf16 on the fast path, else f32

    x_blk = x_ref[0]                      # (X, TM)
    r_blk = r_ref[0]                      # (R, TM)
    u_blk = u_ref[0].astype(f32)          # (R, UV)
    w1 = w1_ref[...].astype(f32)          # (H, R, UV)

    X = x_blk.shape[0]
    V = o_ref.shape[1]
    TM = o_ref.shape[2]

    # a^T[h, r] = sum_uv w1[r,u,v,h] * u[r,u,v]    (tiny; VPU mul + lane reduce)
    a_t = jnp.sum(w1 * u_blk[None, :, :], axis=2)                      # (H, R)

    # b[h, m] = relu( sum_r a^T[h, r] * r[r, m] )  -- MXU, M on lanes
    b = jnp.dot(a_t.astype(mxu_t), r_blk,
                preferred_element_type=f32)                            # (H, TM)
    b = jnp.maximum(b, 0.0)

    # c[x*V+v, m] = sum_h w2[x,v,h] * b[h, m]      -- one fat MXU matmul
    c = jnp.dot(w2_ref[...], b.astype(mxu_t),
                preferred_element_type=f32)                            # (X*V, TM)

    # out[v, m] = sum_x x[x, m] * c[x*V+v, m]      -- VPU, sublane-aligned slices
    out = jnp.zeros((V, TM), f32)
    for xx in range(X):
        out = out + x_blk[xx:xx + 1, :].astype(f32) * c[xx * V:(xx + 1) * V, :]

    o_ref[0] = out.astype(o_ref.dtype)


def _pick_m_tile(M):
    # Largest lane-aligned tile that divides M; otherwise fall back to full M.
    for tm in (1024, 512, 256, 128):
        if M % tm == 0:
            return tm
    return M


def inst_encoder_forward(x, r, u, w1, w2, *, mxu_dtype=None):
    """x:(N,I,J,X), r:(N,I,J,R), u:(N,R,U,V), w1:(R,U,V,H), w2:(X,V,H) -> (N,I,J,V)."""
    N, I, J, X = x.shape
    R = r.shape[3]
    _, _, U, V = u.shape
    H = w1.shape[3]
    M = I * J
    TM = _pick_m_tile(M)

    # Lane-dense / kernel-friendly layouts (wrapper-side layout plumbing only).
    x_t = x.reshape(N, M, X).transpose(0, 2, 1)              # (N, X, M)
    r_t = r.reshape(N, M, R).transpose(0, 2, 1)              # (N, R, M)
    u_f = u.reshape(N, R, U * V)                             # (N, R, U*V)
    w1_t = w1.transpose(3, 0, 1, 2).reshape(H, R, U * V)     # (H, R, U*V)
    w2_f = w2.reshape(X * V, H)                              # (X*V, H)

    if mxu_dtype is not None:
        # bf16 (v6e/v7x) halves HBM/VMEM traffic; accumulation stays f32 in-kernel.
        x_t, r_t, u_f, w1_t, w2_f = [a.astype(mxu_dtype)
                                     for a in (x_t, r_t, u_f, w1_t, w2_f)]

    out = pl.pallas_call(
        inst_encoder_kernel,
        out_shape=jax.ShapeDtypeStruct((N, V, M), jnp.float32),
        grid_spec=pltpu.PrefetchScalarGridSpec(
            num_scalar_prefetch=0,
            grid=(N, M // TM),
            in_specs=[
                pl.BlockSpec((1, X, TM), lambda n, m: (n, 0, m)),
                pl.BlockSpec((1, R, TM), lambda n, m: (n, 0, m)),
                pl.BlockSpec((1, R, U * V), lambda n, m: (n, 0, 0)),
                pl.BlockSpec((H, R, U * V), lambda n, m: (0, 0, 0)),
                pl.BlockSpec((X * V, H), lambda n, m: (0, 0)),
            ],
            out_specs=pl.BlockSpec((1, V, TM), lambda n, m: (n, 0, m)),
        ),
        compiler_params=pltpu.CompilerParams(
            dimension_semantics=("parallel", "parallel")),
    )(x_t, r_t, u_f, w1_t, w2_f)

    return out.transpose(0, 2, 1).reshape(N, I, J, V)


def inst_encoder_reference(x, r, u, w1, w2):
    a = jnp.einsum('ruvh,nruv->nrh', w1, u)
    b = jax.nn.relu(jnp.einsum('nijr,nrh->nijh', r, a))
    c = jnp.einsum('xvh,nijh->nijxv', w2, b)
    return jnp.einsum('nijx,nijxv->nijv', x, c)


def xavier_uniform(key, shape):
    # Matches torch.nn.init.xavier_uniform_ fan computation:
    # fan_in = shape[1]*prod(shape[2:]), fan_out = shape[0]*prod(shape[2:])
    recep = 1
    for d in shape[2:]:
        recep *= d
    fan_in = shape[1] * recep
    fan_out = shape[0] * recep
    bound = (6.0 / (fan_in + fan_out)) ** 0.5
    return jax.random.uniform(key, shape, jnp.float32, -bound, bound)


if __name__ == "__main__":
    # Small, InstEncoder-consistent shapes.
    N, I, J = 2, 4, 4
    x_dim, r_dim, u_dim, v_dim, h_dim = 8, 4, 8, 8, 32

    key = jax.random.PRNGKey(0)
    k_x, k_r, k_u, k_w1, k_w2 = jax.random.split(key, 5)

    x = jax.random.normal(k_x, (N, I, J, x_dim), jnp.float32)
    r = jax.random.normal(k_r, (N, I, J, r_dim), jnp.float32)
    u = jax.random.normal(k_u, (N, r_dim, u_dim, v_dim), jnp.float32)

    w1 = xavier_uniform(k_w1, (r_dim, u_dim, v_dim, h_dim))
    w2 = xavier_uniform(k_w2, (x_dim, v_dim, h_dim))

    ref = inst_encoder_reference(x, r, u, w1, w2)

    # f32 path: exact-tolerance check against the einsum reference.
    out = jax.block_until_ready(inst_encoder_forward(x, r, u, w1, w2))
    assert out.shape == (N, I, J, v_dim)
    assert jnp.allclose(out, ref, atol=1e-4, rtol=1e-4)

    # bf16-MXU / f32-accumulate path (v6e/v7x bandwidth lever); loose tolerance
    # because the operands are rounded to bf16 before the MXU.
    out_bf16 = jax.block_until_ready(
        inst_encoder_forward(x, r, u, w1, w2, mxu_dtype=jnp.bfloat16))
    assert jnp.allclose(out_bf16, ref, atol=1e-1, rtol=1e-1)

    print("KERNEL_OK")
</pallas_src>

<mosaic_0001>
module attributes {stable_mosaic.version = 11 : i64} {
  func.func @inst_encoder_kernel(%arg0: i32, %arg1: i32, %arg2: memref<1x8x16xf32, #tpu.memory_space<vmem>>, %arg3: memref<1x4x16xf32, #tpu.memory_space<vmem>>, %arg4: memref<1x4x64xf32, #tpu.memory_space<vmem>>, %arg5: memref<32x4x64xf32, #tpu.memory_space<vmem>>, %arg6: memref<64x32xf32, #tpu.memory_space<vmem>>, %arg7: memref<1x8x16xf32, #tpu.memory_space<vmem>>) attributes {dimension_semantics = [#tpu.dimension_semantics<parallel>, #tpu.dimension_semantics<parallel>], iteration_bounds = array<i64: 2, 1>, scalar_prefetch = 0 : i64, scratch_operands = 0 : i64, tpu.core_type = #tpu.core_type<tc>, window_params = [{transform_indices = @transform_0, window_bounds = array<i64: 1, 8, 16>}, {transform_indices = @transform_1, window_bounds = array<i64: 1, 4, 16>}, {transform_indices = @transform_2, window_bounds = array<i64: 1, 4, 64>}, {pipeline_mode = #tpu.pipeline_mode<synchronous>, transform_indices = @transform_3, window_bounds = array<i64: 32, 4, 64>}, {pipeline_mode = #tpu.pipeline_mode<synchronous>, transform_indices = @transform_4, window_bounds = array<i64: 64, 32>}, {transform_indices = @transform_5, window_bounds = array<i64: 1, 8, 16>}]} {
    %c0 = arith.constant 0 : index
    %c0_0 = arith.constant 0 : index
    %c0_1 = arith.constant 0 : index
    %0 = vector.load %arg2[%c0, %c0_0, %c0_1] : memref<1x8x16xf32, #tpu.memory_space<vmem>>, vector<1x8x16xf32>
    %1 = vector.shape_cast %0 : vector<1x8x16xf32> to vector<8x16xf32>
    %c0_2 = arith.constant 0 : index
    %c0_3 = arith.constant 0 : index
    %c0_4 = arith.constant 0 : index
    %2 = vector.load %arg3[%c0_2, %c0_3, %c0_4] : memref<1x4x16xf32, #tpu.memory_space<vmem>>, vector<1x4x16xf32>
    %3 = vector.shape_cast %2 : vector<1x4x16xf32> to vector<4x16xf32>
    %c0_5 = arith.constant 0 : index
    %c0_6 = arith.constant 0 : index
    %c0_7 = arith.constant 0 : index
    %4 = vector.load %arg4[%c0_5, %c0_6, %c0_7] : memref<1x4x64xf32, #tpu.memory_space<vmem>>, vector<1x4x64xf32>
    %5 = vector.shape_cast %4 : vector<1x4x64xf32> to vector<4x64xf32>
    %c0_8 = arith.constant 0 : index
    %c0_9 = arith.constant 0 : index
    %c0_10 = arith.constant 0 : index
    %6 = vector.load %arg5[%c0_8, %c0_9, %c0_10] : memref<32x4x64xf32, #tpu.memory_space<vmem>>, vector<32x4x64xf32>
    %7 = vector.shape_cast %5 : vector<4x64xf32> to vector<1x4x64xf32>
    %8 = vector.broadcast %7 : vector<1x4x64xf32> to vector<32x4x64xf32>
    %9 = arith.mulf %6, %8 : vector<32x4x64xf32>
    %cst = arith.constant dense<0.000000e+00> : vector<32x4xf32>
    %10 = vector.multi_reduction <add>, %9, %cst [2] : vector<32x4x64xf32> to vector<32x4xf32>
    %cst_11 = arith.constant dense<0.000000e+00> : vector<32x16xf32>
    %11 = tpu.matmul %10, %3, %cst_11 {dimension_numbers = #tpu.dot_dimension_numbers<[1], [0], [0], [1], [0, 0, 1, 1], [], []>} : vector<32x4xf32>, vector<4x16xf32>, vector<32x16xf32> -> vector<32x16xf32>
    %cst_12 = arith.constant 0.000000e+00 : f32
    %12 = vector.broadcast %cst_12 : f32 to vector<32x16xf32>
    %13 = arith.maximumf %11, %12 : vector<32x16xf32>
    %c0_13 = arith.constant 0 : index
    %c0_14 = arith.constant 0 : index
    %14 = vector.load %arg6[%c0_13, %c0_14] : memref<64x32xf32, #tpu.memory_space<vmem>>, vector<64x32xf32>
    %cst_15 = arith.constant dense<0.000000e+00> : vector<64x16xf32>
    %15 = tpu.matmul %14, %13, %cst_15 {dimension_numbers = #tpu.dot_dimension_numbers<[1], [0], [0], [1], [0, 0, 1, 1], [], []>} : vector<64x32xf32>, vector<32x16xf32>, vector<64x16xf32> -> vector<64x16xf32>
    %cst_16 = arith.constant 0.000000e+00 : f32
    %16 = vector.broadcast %cst_16 : f32 to vector<8x16xf32>
    %17 = vector.extract_strided_slice %1 {offsets = [0, 0], sizes = [1, 16], strides = [1, 1]} : vector<8x16xf32> to vector<1x16xf32>
    %18 = vector.extract_strided_slice %15 {offsets = [0, 0], sizes = [8, 16], strides = [1, 1]} : vector<64x16xf32> to vector<8x16xf32>
    %19 = vector.broadcast %17 : vector<1x16xf32> to vector<8x16xf32>
    %20 = arith.mulf %19, %18 : vector<8x16xf32>
    %21 = arith.addf %16, %20 : vector<8x16xf32>
    %22 = vector.extract_strided_slice %1 {offsets = [1, 0], sizes = [1, 16], strides = [1, 1]} : vector<8x16xf32> to vector<1x16xf32>
    %23 = vector.extract_strided_slice %15 {offsets = [8, 0], sizes = [8, 16], strides = [1, 1]} : vector<64x16xf32> to vector<8x16xf32>
    %24 = vector.broadcast %22 : vector<1x16xf32> to vector<8x16xf32>
    %25 = arith.mulf %24, %23 : vector<8x16xf32>
    %26 = arith.addf %21, %25 : vector<8x16xf32>
    %27 = vector.extract_strided_slice %1 {offsets = [2, 0], sizes = [1, 16], strides = [1, 1]} : vector<8x16xf32> to vector<1x16xf32>
    %28 = vector.extract_strided_slice %15 {offsets = [16, 0], sizes = [8, 16], strides = [1, 1]} : vector<64x16xf32> to vector<8x16xf32>
    %29 = vector.broadcast %27 : vector<1x16xf32> to vector<8x16xf32>
    %30 = arith.mulf %29, %28 : vector<8x16xf32>
    %31 = arith.addf %26, %30 : vector<8x16xf32>
    %32 = vector.extract_strided_slice %1 {offsets = [3, 0], sizes = [1, 16], strides = [1, 1]} : vector<8x16xf32> to vector<1x16xf32>
    %33 = vector.extract_strided_slice %15 {offsets = [24, 0], sizes = [8, 16], strides = [1, 1]} : vector<64x16xf32> to vector<8x16xf32>
    %34 = vector.broadcast %32 : vector<1x16xf32> to vector<8x16xf32>
    %35 = arith.mulf %34, %33 : vector<8x16xf32>
    %36 = arith.addf %31, %35 : vector<8x16xf32>
    %37 = vector.extract_strided_slice %1 {offsets = [4, 0], sizes = [1, 16], strides = [1, 1]} : vector<8x16xf32> to vector<1x16xf32>
    %38 = vector.extract_strided_slice %15 {offsets = [32, 0], sizes = [8, 16], strides = [1, 1]} : vector<64x16xf32> to vector<8x16xf32>
    %39 = vector.broadcast %37 : vector<1x16xf32> to vector<8x16xf32>
    %40 = arith.mulf %39, %38 : vector<8x16xf32>
    %41 = arith.addf %36, %40 : vector<8x16xf32>
    %42 = vector.extract_strided_slice %1 {offsets = [5, 0], sizes = [1, 16], strides = [1, 1]} : vector<8x16xf32> to vector<1x16xf32>
    %43 = vector.extract_strided_slice %15 {offsets = [40, 0], sizes = [8, 16], strides = [1, 1]} : vector<64x16xf32> to vector<8x16xf32>
    %44 = vector.broadcast %42 : vector<1x16xf32> to vector<8x16xf32>
    %45 = arith.mulf %44, %43 : vector<8x16xf32>
    %46 = arith.addf %41, %45 : vector<8x16xf32>
    %47 = vector.extract_strided_slice %1 {offsets = [6, 0], sizes = [1, 16], strides = [1, 1]} : vector<8x16xf32> to vector<1x16xf32>
    %48 = vector.extract_strided_slice %15 {offsets = [48, 0], sizes = [8, 16], strides = [1, 1]} : vector<64x16xf32> to vector<8x16xf32>
    %49 = vector.broadcast %47 : vector<1x16xf32> to vector<8x16xf32>
    %50 = arith.mulf %49, %48 : vector<8x16xf32>
    %51 = arith.addf %46, %50 : vector<8x16xf32>
    %52 = vector.extract_strided_slice %1 {offsets = [7, 0], sizes = [1, 16], strides = [1, 1]} : vector<8x16xf32> to vector<1x16xf32>
    %53 = vector.extract_strided_slice %15 {offsets = [56, 0], sizes = [8, 16], strides = [1, 1]} : vector<64x16xf32> to vector<8x16xf32>
    %54 = vector.broadcast %52 : vector<1x16xf32> to vector<8x16xf32>
    %55 = arith.mulf %54, %53 : vector<8x16xf32>
    %56 = arith.addf %51, %55 : vector<8x16xf32>
    %c0_17 = arith.constant 0 : index
    %c0_18 = arith.constant 0 : index
    %c0_19 = arith.constant 0 : index
    %57 = vector.load %arg7[%c0_17, %c0_18, %c0_19] : memref<1x8x16xf32, #tpu.memory_space<vmem>>, vector<1x8x16xf32>
    %58 = vector.shape_cast %57 : vector<1x8x16xf32> to vector<8x16xf32>
    %59 = vector.shape_cast %56 : vector<8x16xf32> to vector<1x8x16xf32>
    tpu.vector_store %arg7[%c0_17, %c0_18, %c0_19], %59 {strides = array<i32>} : memref<1x8x16xf32, #tpu.memory_space<vmem>>, vector<1x8x16xf32>,
    return
  }
  func.func @transform_0(%arg0: i32, %arg1: i32) -> (i32, i32, i32) {
    %c0_i32 = arith.constant 0 : i32
    %c0_i32_0 = arith.constant 0 : i32
    return %arg0, %c0_i32, %arg1 : i32, i32, i32
  }
  func.func @transform_1(%arg0: i32, %arg1: i32) -> (i32, i32, i32) {
    %c0_i32 = arith.constant 0 : i32
    %c0_i32_0 = arith.constant 0 : i32
    return %arg0, %c0_i32, %arg1 : i32, i32, i32
  }
  func.func @transform_2(%arg0: i32, %arg1: i32) -> (i32, i32, i32) {
    %c0_i32 = arith.constant 0 : i32
    %c0_i32_0 = arith.constant 0 : i32
    %c0_i32_1 = arith.constant 0 : i32
    return %arg0, %c0_i32, %c0_i32_0 : i32, i32, i32
  }
  func.func @transform_3(%arg0: i32, %arg1: i32) -> (i32, i32, i32) {
    %c0_i32 = arith.constant 0 : i32
    %c0_i32_0 = arith.constant 0 : i32
    %c0_i32_1 = arith.constant 0 : i32
    %c0_i32_2 = arith.constant 0 : i32
    return %c0_i32, %c0_i32_0, %c0_i32_1 : i32, i32, i32
  }
  func.func @transform_4(%arg0: i32, %arg1: i32) -> (i32, i32) {
    %c0_i32 = arith.constant 0 : i32
    %c0_i32_0 = arith.constant 0 : i32
    %c0_i32_1 = arith.constant 0 : i32
    return %c0_i32, %c0_i32_0 : i32, i32
  }
  func.func @transform_5(%arg0: i32, %arg1: i32) -> (i32, i32, i32) {
    %c0_i32 = arith.constant 0 : i32
    %c0_i32_0 = arith.constant 0 : i32
    return %arg0, %c0_i32, %arg1 : i32, i32, i32
  }
}

</mosaic_0001>

<bundles_post_ra>
// kernel: tpu_custom_call.1
= control target key start
LH: loop header
LB: loop body
LE: loop exit
PB: predicated region body
PF: predicated region fallthrough
CT: control target
= control target key end

     0   :  { %10 = vsyncpa [#allocation3], 0  ;;  %s1377_s0 = inlined_call_operand.vmem [shape: f32[2,8,16], index: 0, kind: input, shape index: {}]   ;;  %s1378_s1 = inlined_call_operand.vmem [shape: f32[2,4,16], index: 1, kind: input, shape index: {}]   ;;  %s1379_s2 = inlined_call_operand.vmem [shape: f32[2,4,64], index: 2, kind: input, shape index: {}]   ;;  %s1380_s3 = inlined_call_operand.hbm [shape: f32[32,4,64], index: 3, kind: input, shape index: {}]   ;;  %s1381_s4 = inlined_call_operand.vmem [shape: f32[64,32], index: 4, kind: input, shape index: {}]   ;;  %s1382_s5 = inlined_call_operand.hbm [shape: f32[2,8,16], index: 5, kind: output, shape index: {}]  }
   0x1   :  { %11 = vsyncpa [#allocation4], 0 }
   0x2   :  { %13 = vsyncpa [#allocation4 + $0x1], 0  ;;  %s1096_s18 = smov 0   ;;  %s1098_s19 = smov 0  }
   0x3   :  { %s1100_s20 = smov 0   ;;  %s1102_s21 = smov 0  }
   0x4   :  { %s1104_s22 = smov 0   ;;  %s1106_s23 = smov 0  }
   0x5 LB: > { %s845_s24 = sadd.s32 4294967295, %s1061_s23   ;;  %s846_s25 = sadd.s32 4294967294, %s1061_s23   ;;  %s1061_s23 = sphi %s1106_s23, %s19_s23   ;;  %s1057_s22 = sphi %s1104_s22, %s1389_s22   ;;  %s1053_s21 = sphi %s1102_s21, %s1388_s21   ;;  %s1049_s20 = sphi %s1100_s20, %s1387_s20   ;;  %s1045_s19 = sphi %s1098_s19, %s1386_s19   ;;  %s1041_s18 = sphi %s1096_s18, %s1385_s18  }
   0x6   : > { %s31_s26 = sadd.s32 1, %s1057_s22  ;;  %s164_s27 = sadd.s32 1, %s1049_s20 }
   0x7   : > { %p33_p0 = scmp.ge.s32.totalorder %s31_s26, 2  ;;  %p174_p1 = scmp.ne.s32.totalorder %s1049_s20, %s1045_s19 }
   0x8   : > { %p175_p2 = scmp.eq.s32.totalorder %s845_s24, 1  ;;  %p180_p3 = scmp.ne.s32.totalorder %s1045_s19, %s1041_s18 }
   0x9   : > { %s1391_s26 = smov (%p33_p0, %s31_s26), 0  ;;  %p181_p5 = scmp.eq.s32.totalorder %s846_s25, 1 }
   0xa   : > { %p1136_p4 = por %p175_p2, %p174_p1  ;;  %s159_s29 = ssub.s32 %s1057_s22, %s1391_s26 }
   0xb   : > { %p847_p6 = scmp.ge.s32.totalorder %s1061_s23, 1  ;;  %p162_p7 = scmp.eq.s32.totalorder %s159_s29, 0 }
   0xc   : > { %p1143_p8 = por %p181_p5, %p180_p3  ;;  %p188_p9 = scmp.lt.s32.totalorder %s1061_s23, 3 }
   0xd   : > { %s1149_s6 = scalar_select %p162_p7, %s1049_s20, %s164_s27  }
   0xe   : > { %p189_p10 = pnand %p847_p6, %p188_p9  ;;  %p895_p11 = scmp.eq.s32.totalorder %s845_s24, 0 }
   0xf   : > { %s199_s9 = sshll.u32 %s1380_s3, 4  ;;  %s1063_s10 = smov [#allocation2]   ;;  %s200_s9 = int_to_ptr.hbm [resolvable:$true] %s199_s9 }
  0x10   : > { %p887_p12 = pneg %p189_p10  ;;  %s201_s11 = sshll.u32 %s1063_s10, 4  ;;  %s202_s11 = int_to_ptr.vmem [resolvable:$true] %s201_s11 }
  0x11   : > { %s1064_s12 = smov 64   ;;  %s1065_s13 = smov 4  }
  0x12   : > { %p888_p13 = pnand %p895_p11, %p887_p12  ;;  %247 = sbr.rel (%p189_p10) target bundleno = 529 (0x211), region = 40 }
  0x14   : > { %890 = dma.hbm_to_vmem [thread:$0]  (!%p888_p13), %s200_s9, 2048, %s202_s11, [#allocation3], %s1064_s12, %s1064_s12, %s1065_s13  }
  0x17   : > { %1032 = dma.done.wait (%p895_p11), [#allocation3], 2048  }
  0x18   : > { %1034 = vsyncadd (%p895_p11), [#allocation3], 4294965248  ;;  %p289_p0 = scmp.lt.s32.totalorder %s1053_s21, 1  ;;  %vm374_vm0 = vcmask 519168   ;;  %v312_v1 = vld [vmem:[#allocation2 + $0x8] sm:$0xf] }
  0x19   : > { %v310_v2 = vld [vmem:[#allocation2] sm:$0xf]  ;;  %v314_v5 = vld [vmem:[#allocation2 + $0x10] sm:$0xf]  ;;  %v313_v7 = vld [vmem:[#allocation2 + $0xc] sm:$0xf] }
  0x1a   : > { %s1156_s14 = scalar_select %p289_p0, %s1053_s21, 1  ;;  %v311_v8 = vld [vmem:[#allocation2 + $0x4] sm:$0xf]  ;;  %v315_v11 = vld [vmem:[#allocation2 + $0x14] sm:$0xf]  ;;  %vm581_vm1 = vcmask 1043456  }
  0x1b   : > { %v317_v19 = vld [vmem:[#allocation2 + $0x1c] sm:$0xf]  ;;  %v316_v20 = vld [vmem:[#allocation2 + $0x18] sm:$0xf]  ;;  %v318_v21 = vld [vmem:[#allocation2 + $0x20] sm:$0xf] }
  0x1c   : > { %s854_s15 = sshll.u32 %s1156_s14, 2  ;;  %v320_v28 = vld [vmem:[#allocation2 + $0x28] sm:$0xf]  ;;  %v319_v29 = vld [vmem:[#allocation2 + $0x24] sm:$0xf]  ;;  %vm537_vm2 = vcmask 1041409  }
  0x1d   : > { %s306_s24 = scalar_lea.vmem %s1379_s2, %s854_s15  ;;  %v321_v30 = vld [vmem:[#allocation2 + $0x2c] sm:$0xf]  ;;  %v323_v37 = vld [vmem:[#allocation2 + $0x34] sm:$0xf]  ;;  %v322_v38 = vld [vmem:[#allocation2 + $0x30] sm:$0xf]  ;;  %s302_s29 = scalar_lea.vmem %s1378_s1, %s854_s15 }
  0x1e   : > { %v1164_v0 = vld [vmem:[%s306_s24] sm:$0xf]  ;;  %v324_v39 = vld [vmem:[#allocation2 + $0x38] sm:$0xf]  ;;  %v335_v42 = vld [vmem:[#allocation2 + $0x64] sm:$0xf] }
  0x1f   : > { %v344_v3 = vmul.f32 %v312_v1, %v1164_v0  ;;  %v342_v4 = vmul.f32 %v310_v2, %v1164_v0  ;;  %v346_v6 = vmul.f32 %v314_v5, %v1164_v0  ;;  %v345_v13 = vmul.f32 %v313_v7, %v1164_v0  ;;  %v334_v46 = vld [vmem:[#allocation2 + $0x60] sm:$0xf]  ;;  %v336_v51 = vld [vmem:[#allocation2 + $0x68] sm:$0xf]  ;;  %v325_v53 = vld [vmem:[#allocation2 + $0x3c] sm:$0xf] }
  0x20   : > { %v343_v14 = vmul.f32 %v311_v8, %v1164_v0  ;;  %v347_v15 = vmul.f32 %v315_v11, %v1164_v0  ;;  %v349_v22 = vmul.f32 %v317_v19, %v1164_v0  ;;  %v348_v23 = vmul.f32 %v316_v20, %v1164_v0  ;;  %v326_v49 = vld [vmem:[#allocation2 + $0x40] sm:$0xf]  ;;  %v327_v54 = vld [vmem:[#allocation2 + $0x44] sm:$0xf]  ;;  %v337_v61 = vld [vmem:[#allocation2 + $0x6c] sm:$0xf] }
  0x21   : > { %v381_v9 = vsel %vm374_vm0, %v344_v3, 0.0  ;;  %v375_v10 = vsel %vm374_vm0, %v342_v4, 0.0  ;;  %v387_v12 = vsel %vm374_vm0, %v346_v6, 0.0  ;;  %v384_v16 = vsel %vm374_vm0, %v345_v13, 0.0  ;;  %v338_v4 = vld [vmem:[#allocation2 + $0x70] sm:$0xf] }
  0x22   : > { %382 = vadd.xlane.f32.xlu1 %v381_v9  ;;  %376 = vadd.xlane.f32.xlu0 %v375_v10  ;;  %v378_v17 = vsel %vm374_vm0, %v343_v14, 0.0  ;;  %v390_v18 = vsel %vm374_vm0, %v347_v15, 0.0  ;;  %v350_v24 = vmul.f32 %v318_v21, %v1164_v0  ;;  %v396_v25 = vsel %vm374_vm0, %v349_v22, 0.0  ;;  %v329_v5 = vld [vmem:[#allocation2 + $0x4c] sm:$0xf]  ;;  %s853_s9 = sshll.u32 %s1156_s14, 3 }
  0x23   : > { %388 = vadd.xlane.f32.xlu2 %v387_v12  ;;  %v393_v26 = vsel %vm374_vm0, %v348_v23, 0.0  ;;  %v352_v31 = vmul.f32 %v320_v28, %v1164_v0  ;;  %v351_v32 = vmul.f32 %v319_v29, %v1164_v0  ;;  %v353_v33 = vmul.f32 %v321_v30, %v1164_v0  ;;  %v328_v6 = vld [vmem:[#allocation2 + $0x48] sm:$0xf]  ;;  %v339_v8 = vld [vmem:[#allocation2 + $0x74] sm:$0xf]  ;;  %s295_s12 = scalar_lea.vmem %s1377_s0, %s853_s9  ;;  %s286_s14 = sand.u32 1, %s1045_s19  }
  0x24   : > { %v399_v27 = vsel %vm374_vm0, %v350_v24, 0.0  ;;  %v355_v40 = vmul.f32 %v323_v37, %v1164_v0  ;;  %v354_v41 = vmul.f32 %v322_v38, %v1164_v0  ;;  %v356_v43 = vmul.f32 %v324_v39, %v1164_v0  ;;  %v330_v9 = vld [vmem:[#allocation2 + $0x50] sm:$0xf]  ;;  %v340_v15 = vld [vmem:[#allocation2 + $0x78] sm:$0xf]  ;;  %s852_s13 = sshll.u32 %s286_s14, 3 }
  0x25   : > { %v405_v34 = vsel %vm374_vm0, %v352_v31, 0.0  ;;  %v402_v35 = vsel %vm374_vm0, %v351_v32, 0.0  ;;  %v408_v36 = vsel %vm374_vm0, %v353_v33, 0.0  ;;  %v367_v44 = vmul.f32 %v335_v42, %v1164_v0  ;;  %v341_v21 = vld [vmem:[#allocation2 + $0x7c] sm:$0xf]  ;;  %s870_s15 = sshll.u32 %s1053_s21, 3 }
  0x26   : > { %v414_v47 = vsel %vm374_vm0, %v355_v40, 0.0  ;;  %v411_v48 = vsel %vm374_vm0, %v354_v41, 0.0  ;;  %v366_v50 = vmul.f32 %v334_v46, %v1164_v0  ;;  %v417_v52 = vsel %vm374_vm0, %v356_v43, 0.0  ;;  %v332_v23 = vld [vmem:[#allocation2 + $0x58] sm:$0xf]  ;;  %s730_s24 = scalar_lea.hbm %s1382_s5, %s870_s15  ;;  %s288_s25 = scalar_lea.vmem [#allocation5], %s852_s13 }
  0x27   : > { %v1195_v45 = vsel %vm374_vm0, %v367_v44, 0.0  ;;  %v368_v55 = vmul.f32 %v336_v51, %v1164_v0  ;;  %v358_v58 = vmul.f32 %v326_v49, %v1164_v0  ;;  %v357_v59 = vmul.f32 %v325_v53, %v1164_v0  ;;  %v331_v24 = vld [vmem:[#allocation2 + $0x54] sm:$0xf]  ;;  %s732_s27 = sshll.u32 %s288_s25, 4  ;;  %s719_s21 = scalar_lea.sflag [#allocation4], %s286_s14  ;;  %s733_s27 = int_to_ptr.vmem [resolvable:$true] %s732_s27 }
  0x28   : > { %v447_v56 = vsel %vm374_vm0, %v366_v50, 0.0  ;;  %v359_v60 = vmul.f32 %v327_v54, %v1164_v0  ;;  %v369_v62 = vmul.f32 %v337_v61, %v1164_v0  ;;  %v370_v7 = vmul.f32 %v338_v4, %v1164_v0  ;;  %s999_s11 = scalar_lea.hbm %s1382_s5, 16 }
  0x29   : > { %v453_v57 = vsel %vm374_vm0, %v368_v55, 0.0  ;;  %v423_v1 = vsel %vm374_vm0, %v358_v58, 0.0  ;;  %v420_v2 = vsel %vm374_vm0, %v357_v59, 0.0  ;;  %v371_v10 = vmul.f32 %v339_v8, %v1164_v0 }
  0x2a   : > { %385 = vadd.xlane.f32.xlu1 %v384_v16  ;;  %379 = vadd.xlane.f32.xlu0 %v378_v17  ;;  %v456_v63 = vsel %vm374_vm0, %v369_v62, 0.0  ;;  %v426_v3 = vsel %vm374_vm0, %v359_v60, 0.0  ;;  %v459_v11 = vsel %vm374_vm0, %v370_v7, 0.0  ;;  %v361_v12 = vmul.f32 %v329_v5, %v1164_v0 }
  0x2b   : > { %391 = vadd.xlane.f32.xlu2 %v390_v18  ;;  %v360_v13 = vmul.f32 %v328_v6, %v1164_v0  ;;  %v462_v14 = vsel %vm374_vm0, %v371_v10, 0.0  ;;  %v362_v16 = vmul.f32 %v330_v9, %v1164_v0  ;;  %v372_v17 = vmul.f32 %v340_v15, %v1164_v0 }
  0x2c   : > { %v432_v19 = vsel %vm374_vm0, %v361_v12, 0.0  ;;  %v364_v28 = vmul.f32 %v332_v23, %v1164_v0  ;;  %v363_v29 = vmul.f32 %v331_v24, %v1164_v0  ;;  %vm539_vm3 = vcmask 1042434  }
  0x2d   : > { %v465_v18 = vsel %vm374_vm0, %v372_v17, 0.0  ;;  %v429_v20 = vsel %vm374_vm0, %v360_v13, 0.0  ;;  %v435_v22 = vsel %vm374_vm0, %v362_v16, 0.0  ;;  %vm541_vm4 = vcmask 1043459  }
  0x2e   : > { %v441_v31 = vsel %vm374_vm0, %v364_v28, 0.0  ;;  %v438_v32 = vsel %vm374_vm0, %v363_v29, 0.0  ;;  %vm543_vm5 = vcmask 1044484   ;;  %vm545_vm6 = vcmask 1045509  }
  0x2f   : > { %vm547_vm7 = vcmask 1046534   ;;  %vm549_vm8 = vcmask 1047559   ;;  %vm572_vm9 = vcmask 31744   ;;  %vm626_vm10 = vcmask 261120  }
  0x30   : > { %vm716_vm11 = vcmask 130048  }
  0x32   : > { %397 = vadd.xlane.f32.xlu1 %v396_v25  ;;  %394 = vadd.xlane.f32.xlu0 %v393_v26  ;;  %v373_v25 = vmul.f32 %v341_v21, %v1164_v0  ;;  %v333_v26 = vld [vmem:[#allocation2 + $0x5c] sm:$0xf] }
  0x33   : > { %400 = vadd.xlane.f32.xlu2 %v399_v27  ;;  %v365_v30 = vmul.f32 %v333_v26, %v1164_v0  ;;  %v308_v0 = vld [vmem:[%s302_s29] sm:$0xf]  ;;  %s734_s29 = sshll.u32 %s730_s24, 4  ;;  %s735_s29 = int_to_ptr.hbm [resolvable:$true] %s734_s29 }
  0x34   : > { %v468_v27 = vsel %vm374_vm0, %v373_v25, 0.0  ;;  %856 = vmatpush.msk.msra.mxu0 %vm581_vm1, %v308_v0  ;;  %s993_s7 = sshra.s32 %s735_s29, 4  ;;  %s994_s7 = int_to_ptr.hbm [resolvable:$true] %s993_s7 }
  0x35   : > { %v444_v33 = vsel %vm374_vm0, %v365_v30, 0.0  ;;  %s995_s8 = scalar_lea.hbm %s994_s7, 8  ;;  %p1000_p5 = scmp.lt.s32.totalorder %s994_s7, %s1382_s5 }
  0x36   : > { %p996_p1 = scmp.ne.s32.totalorder %s994_s7, %s995_s8  ;;  %p1001_p6 = scmp.lt.s32.totalorder %s999_s11, %s995_s8 }
  0x38   : > { %p997_p2 = pnand %p996_p1, %p1136_p4  ;;  %p1002_p7 = por %p1001_p6, %p1000_p5 }
  0x3a   : > { %406 = vadd.xlane.f32.xlu1 %v405_v34  ;;  %403 = vadd.xlane.f32.xlu0 %v402_v35  ;;  %p998_p3 = pneg %p997_p2 }
  0x3b   : > { %409 = vadd.xlane.f32.xlu2 %v408_v36  ;;  %v503_v36 = vlaneseq }
  0x3c   : > { %p1003_p9 = pnand %p1002_p7, %p998_p3 }
  0x3d   : > { %v1238_v38 = vand.u32 127, %v503_v36 }
  0x42   : > { %415 = vadd.xlane.f32.xlu1 %v414_v47  ;;  %412 = vadd.xlane.f32.xlu0 %v411_v48 }
  0x43   : > { %418 = vadd.xlane.f32.xlu2 %v417_v52 }
  0x4a   : > { %424 = vadd.xlane.f32.xlu1 %v423_v1  ;;  %421 = vadd.xlane.f32.xlu0 %v420_v2 }
  0x4b   : > { %427 = vadd.xlane.f32.xlu2 %v426_v3 }
  0x52   : > { %433 = vadd.xlane.f32.xlu1 %v432_v19  ;;  %430 = vadd.xlane.f32.xlu0 %v429_v20 }
  0x53   : > { %436 = vadd.xlane.f32.xlu2 %v435_v22 }
  0x5a   : > { %442 = vadd.xlane.f32.xlu1 %v441_v31  ;;  %439 = vadd.xlane.f32.xlu0 %v438_v32 }
  0x5b   : > { %445 = vadd.xlane.f32.xlu2 %v444_v33 }
  0x62   : > { %451 = vadd.xlane.f32.xlu1 %v1195_v45  ;;  %448 = vadd.xlane.f32.xlu0 %v447_v56 }
  0x63   : > { %454 = vadd.xlane.f32.xlu2 %v453_v57 }
  0x6a   : > { %457 = vadd.xlane.f32.xlu0 %v456_v63  ;;  %460 = vadd.xlane.f32.xlu1 %v459_v11 }
  0x6b   : > { %463 = vadd.xlane.f32.xlu2 %v462_v14 }
  0x72   : > { %466 = vadd.xlane.f32.xlu0 %v465_v18  ;;  %469 = vadd.xlane.f32.xlu1 %v468_v27 }
  0x95   : > { %v383_v34 = vpop.xlane.xlu1 %382  ;;  %v377_v35 = vpop.xlane.xlu0 %376 }
  0x96   : > { %v389_v37 = vpop.xlane.xlu2 %388  ;;  %v505_v41 = vperm.slane %v377_v35, %v1238_v38  ;;  %v507_v45 = vperm.slane %v383_v34, %v1238_v38 }
  0x97   : > { %v509_v48 = vperm.slane %v389_v37, %v1238_v38 }
  0x9d   : > { %v386_v39 = vpop.xlane.xlu1 %385  ;;  %v380_v40 = vpop.xlane.xlu0 %379 }
  0x9e   : > { %v508_v42 = vperm.slane %v386_v39, %v1238_v38  ;;  %v506_v43 = vperm.slane %v380_v40, %v1238_v38  ;;  %v392_v44 = vpop.xlane.xlu2 %391 }
  0x9f   : > { %v510_v50 = vperm.slane %v392_v44, %v1238_v38 }
  0xa0   : > { %v538_v46 = vsel %vm537_vm2, %v506_v43, %v505_v41 }
  0xa1   : > { %v540_v47 = vsel %vm539_vm3, %v507_v45, %v538_v46 }
  0xa2   : > { %v542_v49 = vsel %vm541_vm4, %v508_v42, %v540_v47 }
  0xa3   : > { %v544_v51 = vsel %vm543_vm5, %v509_v48, %v542_v49 }
  0xa4   : > { %v546_v57 = vsel %vm545_vm6, %v510_v50, %v544_v51 }
  0xa5   : > { %v398_v52 = vpop.xlane.xlu1 %397  ;;  %v395_v53 = vpop.xlane.xlu0 %394 }
  0xa6   : > { %v512_v54 = vperm.slane %v398_v52, %v1238_v38  ;;  %v511_v55 = vperm.slane %v395_v53, %v1238_v38  ;;  %v401_v56 = vpop.xlane.xlu2 %400 }
  0xa7   : > { %v513_v62 = vperm.slane %v401_v56, %v1238_v38 }
  0xa8   : > { %v548_v58 = vsel %vm547_vm7, %v511_v55, %v546_v57 }
  0xa9   : > { %v550_v59 = vsel %vm549_vm8, %v512_v54, %v548_v58 }
  0xaa   : > { %857 = vmatmul.msk.f32.vlgmr.msra.gmra.mxu0 %vm572_vm9, %v550_v59 }
  0xad   : > { %v407_v60 = vpop.xlane.xlu1 %406  ;;  %v404_v61 = vpop.xlane.xlu0 %403 }
  0xae   : > { %v514_v63 = vperm.slane %v404_v61, %v1238_v38  ;;  %v410_v1 = vpop.xlane.xlu2 %409  ;;  %v515_v2 = vperm.slane %v407_v60, %v1238_v38 }
  0xaf   : > { %v516_v4 = vperm.slane %v410_v1, %v1238_v38 }
  0xb0   : > { %v551_v3 = vsel %vm537_vm2, %v514_v63, %v513_v62 }
  0xb1   : > { %v552_v5 = vsel %vm539_vm3, %v515_v2, %v551_v3 }
  0xb2   : > { %v553_v10 = vsel %vm541_vm4, %v516_v4, %v552_v5 }
  0xb5   : > { %v416_v6 = vpop.xlane.xlu1 %415  ;;  %v413_v7 = vpop.xlane.xlu0 %412 }
  0xb6   : > { %v517_v8 = vperm.slane %v413_v7, %v1238_v38  ;;  %v419_v9 = vpop.xlane.xlu2 %418  ;;  %v518_v11 = vperm.slane %v416_v6, %v1238_v38 }
  0xb7   : > { %v519_v13 = vperm.slane %v419_v9, %v1238_v38  ;;  %v618_v9 = vld [vmem:[%s1381_s4] sm:$0xff] }
  0xb8   : > { %v554_v12 = vsel %vm543_vm5, %v517_v8, %v553_v10  ;;  %v621_v10 = vld [vmem:[%s1381_s4 + $0x18] sm:$0xff] }
  0xb9   : > { %v555_v14 = vsel %vm545_vm6, %v518_v11, %v554_v12  ;;  %v624_v11 = vld [vmem:[%s1381_s4 + $0x30] sm:$0xff]  ;;  %v619_v12 = vld [vmem:[%s1381_s4 + $0x8] sm:$0xff] }
  0xba   : > { %v556_v19 = vsel %vm547_vm7, %v519_v13, %v555_v14  ;;  %v622_v13 = vld [vmem:[%s1381_s4 + $0x20] sm:$0xff]  ;;  %v625_v14 = vld [vmem:[%s1381_s4 + $0x38] sm:$0xff] }
  0xbd   : > { %v425_v15 = vpop.xlane.xlu1 %424  ;;  %v422_v16 = vpop.xlane.xlu0 %421 }
  0xbe   : > { %v520_v17 = vperm.slane %v422_v16, %v1238_v38  ;;  %v428_v18 = vpop.xlane.xlu2 %427  ;;  %v521_v21 = vperm.slane %v425_v15, %v1238_v38  ;;  %v620_v15 = vld [vmem:[%s1381_s4 + $0x10] sm:$0xff]  ;;  %v623_v16 = vld [vmem:[%s1381_s4 + $0x28] sm:$0xff] }
  0xbf   : > { %v522_v22 = vperm.slane %v428_v18, %v1238_v38 }
  0xc0   : > { %v557_v20 = vsel %vm549_vm8, %v520_v17, %v556_v19  ;;  %v307_v19 = vld [vmem:[%s295_s12] sm:$0xff] }
  0xc1   : > { %858 = vmatmul.msk.f32.gmra.mxu0 %vm572_vm9, %v557_v20  ;;  %v558_v27 = vsel %vm537_vm2, %v522_v22, %v521_v21  ;;  %v695_v21 = vperm.slane %v307_v19, 1  ;;  %v692_v22 = vperm.slane %v307_v19, 0 }
  0xc5   : > { %v434_v23 = vpop.xlane.xlu1 %433  ;;  %v431_v24 = vpop.xlane.xlu0 %430 }
  0xc6   : > { %v523_v25 = vperm.slane %v431_v24, %v1238_v38  ;;  %v437_v26 = vpop.xlane.xlu2 %436  ;;  %v524_v28 = vperm.slane %v434_v23, %v1238_v38  ;;  %v698_v24 = vperm.slane %v307_v19, 2 }
  0xc7   : > { %v525_v30 = vperm.slane %v437_v26, %v1238_v38 }
  0xc8   : > { %v559_v29 = vsel %vm539_vm3, %v523_v25, %v558_v27  ;;  %v701_v27 = vperm.slane %v307_v19, 3 }
  0xc9   : > { %v560_v31 = vsel %vm541_vm4, %v524_v28, %v559_v29 }
  0xca   : > { %v561_v36 = vsel %vm543_vm5, %v525_v30, %v560_v31  ;;  %v704_v31 = vperm.slane %v307_v19, 4 }
  0xcd   : > { %v443_v32 = vpop.xlane.xlu1 %442  ;;  %v440_v33 = vpop.xlane.xlu0 %439 }
  0xce   : > { %v527_v0 = vperm.slane %v443_v32, %v1238_v38  ;;  %v526_v34 = vperm.slane %v440_v33, %v1238_v38  ;;  %v446_v35 = vpop.xlane.xlu2 %445 }
  0xcf   : > { %v528_v37 = vperm.slane %v446_v35, %v1238_v38 }
  0xd0   : > { %v562_v39 = vsel %vm545_vm6, %v526_v34, %v561_v36  ;;  %v707_v34 = vperm.slane %v307_v19, 5 }
  0xd1   : > { %v563_v40 = vsel %vm547_vm7, %v527_v0, %v562_v39  ;;  %v713_v39 = vperm.slane %v307_v19, 7 }
  0xd2   : > { %v564_v41 = vsel %vm549_vm8, %v528_v37, %v563_v40  ;;  %v710_v37 = vperm.slane %v307_v19, 6 }
  0xd3   : > { %859 = vmatmul.msk.f32.gmra.mxu0 %vm572_vm9, %v564_v41 }
  0xd5   : > { %v452_v42 = vpop.xlane.xlu1 %451  ;;  %v449_v43 = vpop.xlane.xlu0 %448 }
  0xd6   : > { %v530_v44 = vperm.slane %v452_v42, %v1238_v38  ;;  %v529_v45 = vperm.slane %v449_v43, %v1238_v38  ;;  %v455_v46 = vpop.xlane.xlu2 %454 }
  0xd7   : > { %v531_v47 = vperm.slane %v455_v46, %v1238_v38 }
  0xd8   : > { %v565_v48 = vsel %vm537_vm2, %v530_v44, %v529_v45 }
  0xd9   : > { %v566_v49 = vsel %vm539_vm3, %v531_v47, %v565_v48 }
  0xdd   : > { %v458_v50 = vpop.xlane.xlu0 %457  ;;  %v461_v51 = vpop.xlane.xlu1 %460 }
  0xde   : > { %v532_v52 = vperm.slane %v458_v50, %v1238_v38  ;;  %v533_v53 = vperm.slane %v461_v51, %v1238_v38  ;;  %v464_v54 = vpop.xlane.xlu2 %463 }
  0xdf   : > { %v534_v55 = vperm.slane %v464_v54, %v1238_v38 }
  0xe0   : > { %v567_v56 = vsel %vm541_vm4, %v532_v52, %v566_v49 }
  0xe1   : > { %v568_v57 = vsel %vm543_vm5, %v533_v53, %v567_v56 }
  0xe2   : > { %v569_v58 = vsel %vm545_vm6, %v534_v55, %v568_v57 }
  0xe5   : > { %v467_v59 = vpop.xlane.xlu0 %466  ;;  %v470_v60 = vpop.xlane.xlu1 %469 }
  0xe6   : > { %v535_v61 = vperm.slane %v467_v59, %v1238_v38  ;;  %v536_v62 = vperm.slane %v470_v60, %v1238_v38 }
  0xe8   : > { %v570_v63 = vsel %vm547_vm7, %v535_v61, %v569_v58 }
  0xe9   : > { %v571_v1 = vsel %vm549_vm8, %v536_v62, %v570_v63 }
  0xea   : > { %860 = vmatmul.msk.f32.gmra.mxu0 %vm572_vm9, %v571_v1 }
 0x127   : > { %v602_v2 = vpop.f32.mrf.mxu0 }
 0x128   : > { %v614_v38 = vmax.f32 %v602_v2, 0.0 }
 0x13e   : > { %v605_v3 = vpop.f32.mrf.mxu0 }
 0x13f   : > { %v615_v8 = vmax.f32 %v605_v3, 0.0 }
 0x150   : > { %v608_v4 = vpop.f32.mrf.mxu0 }
 0x151   : > { %v616_v7 = vmax.f32 %v608_v4, 0.0 }
 0x167   : > { %v611_v5 = vpop.f32.mrf.mxu0 }
 0x168   : > { %v617_v6 = vmax.f32 %v611_v5, 0.0 }
 0x16a   : > { %663 = vmatpush.msra.mxu1 %v617_v6  ;;  %873 = vmatpush.msra.mxu2 %v617_v6 }
 0x16b   : > { %874 = vmatpush.msra.mxu3 %v617_v6 }
 0x16c   : > { %664 = vmatpush.msra.mxu1 %v616_v7  ;;  %875 = vmatpush.msra.mxu2 %v616_v7 }
 0x16d   : > { %876 = vmatpush.msra.mxu3 %v616_v7 }
 0x16e   : > { %665 = vmatpush.msra.mxu1 %v615_v8  ;;  %877 = vmatpush.msra.mxu2 %v615_v8 }
 0x16f   : > { %878 = vmatpush.msra.mxu3 %v615_v8 }
 0x170   : > { %666 = vmatpush.msra.mxu1 %v614_v38  ;;  %879 = vmatpush.msra.mxu2 %v614_v38 }
 0x171   : > { %880 = vmatpush.msra.mxu3 %v614_v38  ;;  %861 = vmatmul.msk.f32.vlgmr.msra.gmra.mxu1 %vm626_vm10, %v618_v9 }
 0x172   : > { %864 = vmatmul.msk.f32.vlgmr.msra.gmra.mxu2 %vm626_vm10, %v621_v10  ;;  %867 = vmatmul.msk.f32.vlgmr.msra.gmra.mxu3 %vm626_vm10, %v624_v11 }
 0x179   : > { %862 = vmatmul.msk.f32.gmra.mxu1 %vm626_vm10, %v619_v12 }
 0x17a   : > { %865 = vmatmul.msk.f32.gmra.mxu2 %vm626_vm10, %v622_v13  ;;  %868 = vmatmul.msk.f32.gmra.mxu3 %vm626_vm10, %v625_v14 }
 0x181   : > { %863 = vmatmul.msk.f32.gmra.mxu1 %vm626_vm10, %v620_v15 }
 0x182   : > { %866 = vmatmul.msk.f32.gmra.mxu2 %vm626_vm10, %v623_v16 }
 0x1ee   : > { %v668_v17 = vpop.f32.mrf.mxu1 }
 0x1ef   : > { %v693_v26 = vmul.f32 %v692_v22, %v668_v17 }
 0x1f5   : > { %v677_v18 = vpop.f32.mrf.mxu2  ;;  %v686_v25 = vpop.f32.mrf.mxu3 }
 0x1f6   : > { %v671_v20 = vpop.f32.mrf.mxu1  ;;  %v702_v33 = vmul.f32 %v701_v27, %v677_v18  ;;  %v711_v44 = vmul.f32 %v710_v37, %v686_v25 }
 0x1f7   : > { %v696_v23 = vmul.f32 %v695_v21, %v671_v20 }
 0x1f9   : > { %v697_v30 = vadd.f32 %v696_v23, %v693_v26 }
 0x1fd   : > { %v680_v28 = vpop.f32.mrf.mxu2  ;;  %v689_v42 = vpop.f32.mrf.mxu3 }
 0x1fe   : > { %v674_v29 = vpop.f32.mrf.mxu1  ;;  %v705_v35 = vmul.f32 %v704_v31, %v680_v28  ;;  %v714_v46 = vmul.f32 %v713_v39, %v689_v42 }
 0x1ff   : > { %v699_v32 = vmul.f32 %v698_v24, %v674_v29 }
 0x201   : > { %v700_v0 = vadd.f32 %v699_v32, %v697_v30 }
 0x203   : > { %v703_v36 = vadd.f32 %v702_v33, %v700_v0 }
 0x205   : > { %v683_v40 = vpop.f32.mrf.mxu2  ;;  %v706_v41 = vadd.f32 %v705_v35, %v703_v36 }
 0x206   : > { %v708_v43 = vmul.f32 %v707_v34, %v683_v40 }
 0x208   : > { %v709_v45 = vadd.f32 %v708_v43, %v706_v41 }
 0x20a   : > { %v712_v47 = vadd.f32 %v711_v44, %v709_v45 }
 0x20c   : > { %v715_v48 = vadd.f32 %v714_v46, %v712_v47 }
 0x20e   : > { %717 = vst.msk [vmem:[%s288_s25] sm:$0xff] %vm716_vm11, %v715_v48 }
 0x20f   : > { %1006 = shalt.err (!%p1003_p9)
}
 0x210   : > { %885 = dma.vmem_to_hbm [thread:$0]  (%p1136_p4), %s733_s27, 128, %s735_s29, %s719_s21  }
 0x211 PF: > { %p897_p10 = scmp.ge.s32.totalorder %s1061_s23, 2  ;;  %s746_s14 = sand.u32 1, %s1041_s18  }
 0x212   : > { %s747_s15 = scalar_lea.sflag [#allocation4], %s746_s14 }
 0x213   : > { %p892_p11 = pnand %p897_p10, %p1143_p8 }
 0x215   : > { %p893_p12 = pneg %p892_p11 }
 0x217   : > { %1036 = dma.done.wait (%p893_p12), %s747_s15, 128  }
 0x218   : > { %1038 = vsyncadd (%p893_p12), %s747_s15, 4294967168  ;;  %s19_s23 = sadd.s32 1, %s1061_s23   ;;  %s1385_s18 = smov %s1045_s19 }
 0x219   : > { %p16_p13 = scmp.ge.s32.totalorder %s19_s23, 4   ;;  %s1386_s19 = smov %s1049_s20 }
 0x21a   : > { %s1387_s20 = smov %s1149_s6  ;;  %s1388_s21 = smov %s1057_s22 }
 0x21b   : > { %s1389_s22 = smov %s1391_s26  ;;  %18 = sbr.rel (!%p16_p13) target bundleno = 5 (0x5), region = 86 }
 0x220   :  { %753 = vsyncpa [#allocation3], 1 }
 0x221   :  { %755 = vsyncpa [#allocation3 + $0x1], 1 }
 0x222   :  { %756 = vsyncpa [#allocation4], 1 }
 0x223   :  { %758 = vsyncpa [#allocation4 + $0x1], 1 }

</bundles_post_ra>
